<compile_context>
chip_gen: v7x
topology: tpu7x:2x2x1
jax: 0.10.0
libtpu: 0.0.40
codegen_flags: <defaults>
</compile_context>

<pallas_src>
import functools

import numpy as np
import jax
import jax.numpy as jnp
from jax.experimental import pallas as pl
from jax.experimental.pallas import tpu as pltpu


_MATMUL_SMOOTHING_MAX_C = 512  # use the MXU banded matmul up to this many classes


def _round_up(x, m):
    return ((x + m - 1) // m) * m


def _sublane_multiple(dtype):
    # native sublane packing: f32 -> 8, bf16/f16 -> 16, int8/fp8 -> 32
    return max(8, 32 // jnp.dtype(dtype).itemsize)


def _ce_framewise_kernel(logits_ref, target_ref, *rest, rows_total, block_rows,
                         num_classes, label_smoothing, class_probs,
                         smoothing_mode, smoothing_weights):
    """One grid step = one (block_rows, C) slab of flattened (batch*frame) rows.

    Writes its partial loss-sum into element (0, 0) of a dense (8, 128) tile.
    """
    if smoothing_mode == "matmul":
        smooth_ref, out_ref = rest
    else:
        (out_ref,) = rest

    logits = logits_ref[...].astype(jnp.float32)      # (R, C)  cast in-register
    tgt = target_ref[...].astype(jnp.float32)         # (R, C)
    R, C = logits.shape

    # (1, C) lane iota; comparisons broadcast -- never materialize an (R, C) iota.
    col = None
    if smoothing_mode == "roll" or (not class_probs):
        col = jax.lax.broadcasted_iota(jnp.int32, (1, C), 1)

    # ---- class-axis "frame smoothing" (zero-padded cross-correlation) ----
    if smoothing_mode == "matmul":
        # banded (C, C) matrix, resident in VMEM; the conv becomes one MXU matmul.
        tgt = jnp.dot(tgt, smooth_ref[...],
                      preferred_element_type=jnp.float32,
                      precision=jax.lax.Precision.HIGHEST)
    elif smoothing_mode == "roll":
        # K shifted multiply-adds: XLU rolls + VPU madds (large, lane-aligned C only).
        K = len(smoothing_weights)
        P = K // 2
        sm = jnp.zeros_like(tgt)
        for k, wk in enumerate(smoothing_weights):
            s = k - P                                  # smoothed[c] += w[k] * tgt[c + s]
            if s == 0:
                sm = sm + wk * tgt
            else:
                rolled = pltpu.roll(tgt, shift=(-s) % C, axis=1)
                lane_ok = (col < (C - s)) if s > 0 else (col >= (-s))
                sm = sm + wk * jnp.where(lane_ok, rolled, 0.0)
        tgt = sm

    # ---- log-softmax pieces in f32 (log_p itself is never materialized) ----
    m = jnp.max(logits, axis=-1, keepdims=True)
    z = logits - m
    lse = jnp.log(jnp.sum(jnp.exp(z), axis=-1, keepdims=True))      # (R, 1)

    if class_probs:
        base = tgt
    else:
        # first-occurrence argmax (matches torch.argmax) without gather.
        mx = jnp.max(tgt, axis=-1, keepdims=True)
        y = jnp.min(jnp.where(tgt == mx, col, C), axis=-1, keepdims=True)   # (R, 1)
        base = (col == y).astype(jnp.float32)

    # torch label smoothing: q = (1-eps)*target + eps/C
    q = (1.0 - label_smoothing) * base + label_smoothing / num_classes

    # loss_row = -sum(q * (z - lse)) = sum(q) * lse - sum(q * z)
    qz = jnp.sum(q * z, axis=-1, keepdims=True)                      # (R, 1)
    if class_probs:
        sum_q = ((1.0 - label_smoothing) * jnp.sum(base, axis=-1, keepdims=True)
                 + label_smoothing)
    else:
        sum_q = 1.0        # one-hot + uniform smoothing sums to exactly 1
    loss_rows = sum_q * lse - qz                                     # (R, 1)

    # Rows past rows_total (only in the partial last block) hold unspecified VMEM
    # data; a single (R, 1) select on the per-row result keeps NaN/Inf out of the sum.
    if (rows_total % block_rows) != 0:
        row = jax.lax.broadcasted_iota(jnp.int32, (R, 1), 0)
        valid = (row + pl.program_id(0) * block_rows) < rows_total
        loss_rows = jnp.where(valid, loss_rows, 0.0)

    partial = jnp.sum(loss_rows, axis=0, keepdims=True)              # (1, 1)

    # Dense unmasked (8, 128) store; only element (0, 0) carries the partial so the
    # wrapper's contiguous jnp.sum over all tiles is exact (no strided gather).
    sub = jax.lax.broadcasted_iota(jnp.int32, (8, 128), 0)
    lane = jax.lax.broadcasted_iota(jnp.int32, (8, 128), 1)
    tile = jnp.broadcast_to(partial, (8, 128))
    out_ref[...] = jnp.where((sub == 0) & (lane == 0), tile, 0.0)


def ce_framewise_loss(output, target, *, reduction='mean', label_smoothing=0.0,
                      class_probs=False, frame_smoothing_kernel=None,
                      block_rows=None):
    """output, target: [batch, num_frames, num_classes]. Returns a scalar loss."""
    if reduction not in ('sum', 'mean'):
        raise ValueError(f'Invalid reduction: {reduction}')
    B, T, C = output.shape
    rows = B * T

    weights = None
    smoothing_mode = None
    smooth_mat = None
    if frame_smoothing_kernel is not None:
        weights = tuple(float(w) for w in frame_smoothing_kernel)
        if len(weights) % 2 == 0:
            raise ValueError('frame_smoothing_kernel should be an odd-sized kernel')
        P = len(weights) // 2
        # pltpu.roll along classes needs lane-exact C; for small C (MXU idle anyway)
        # or non-lane-aligned C use a banded (C, C) matmul instead.
        if C <= _MATMUL_SMOOTHING_MAX_C or (C % 128) != 0:
            smoothing_mode = 'matmul'
            S = np.zeros((C, C), np.float32)
            for k, wk in enumerate(weights):
                S += np.float32(wk) * np.eye(C, dtype=np.float32, k=-(k - P))
            smooth_mat = jnp.asarray(S)
        else:
            smoothing_mode = 'roll'

    # Free leading-dim merge; no transpose, no wrapper astype (kernel casts in-register).
    logits2d = output.reshape(rows, C)
    target2d = target.reshape(rows, C)

    # --- tile sizing against the real (generation-aware) VMEM budget ---
    in_itemsize = (jnp.dtype(output.dtype).itemsize + jnp.dtype(target.dtype).itemsize)
    sublane = max(_sublane_multiple(output.dtype), _sublane_multiple(target.dtype))
    try:
        vmem_cap = int(pltpu.get_tpu_info().vmem_capacity_bytes)
    except Exception:
        vmem_cap = 64 * 1024 * 1024            # conservative fallback (v7x per-TC VMEM)
    vmem_budget = (vmem_cap * 3) // 4          # headroom for compiler scratch / sems
    # per-row footprint: 2 pipeline buffers per input (native dtype) plus ~6 live f32
    # (R, C) intermediates the body materializes (logits, tgt/sm, z, exp, base, q*z).
    bytes_per_row = 2 * C * in_itemsize + 6 * C * 4
    fixed = 2 * 8 * 128 * 4                    # double-buffered (8,128) output tile
    if smoothing_mode == 'matmul':
        fixed += 2 * C * C * 4                 # resident banded smoothing matrix

    if block_rows is None:
        cap_rows = max(sublane, (vmem_budget - fixed) // max(bytes_per_row, 1))
        cap_rows = max(sublane, (cap_rows // sublane) * sublane)
        block_rows = min(cap_rows, _round_up(rows, sublane))
        # keep >= 2 grid blocks whenever possible so v7x's two TensorCores both get work
        if rows > 2 * sublane:
            block_rows = min(block_rows, _round_up(pl.cdiv(rows, 2), sublane))
    block_rows = max(sublane, (int(block_rows) // sublane) * sublane)
    num_blocks = pl.cdiv(rows, block_rows)

    kernel = functools.partial(
        _ce_framewise_kernel,
        rows_total=rows, block_rows=block_rows, num_classes=C,
        label_smoothing=float(label_smoothing), class_probs=bool(class_probs),
        smoothing_mode=smoothing_mode, smoothing_weights=weights)

    in_specs = [
        pl.BlockSpec((block_rows, C), lambda i: (i, 0)),
        pl.BlockSpec((block_rows, C), lambda i: (i, 0)),
    ]
    args = [logits2d, target2d]
    if smoothing_mode == 'matmul':
        in_specs.append(pl.BlockSpec((C, C), lambda i: (0, 0)))   # loaded once, resident
        args.append(smooth_mat)

    partials = pl.pallas_call(
        kernel,
        out_shape=jax.ShapeDtypeStruct((8 * num_blocks, 128), jnp.float32),
        grid=(num_blocks,),
        in_specs=in_specs,
        out_specs=pl.BlockSpec((8, 128), lambda i: (i, 0)),
        compiler_params=pltpu.CompilerParams(
            dimension_semantics=("parallel",),      # independent partial sums per block
            vmem_limit_bytes=int(vmem_budget)),
    )(*args)

    total = jnp.sum(partials)          # dense contiguous reduce (exact: one nonzero/tile)
    # per-frame loss = mean over batch; 'mean' reduction also averages over frames.
    scale = (1.0 / (B * T)) if reduction == 'mean' else (1.0 / B)
    return total * scale
    # TODO(synk): compute_jit in the PyTorch module only toggles TorchScript and does not
    # change the math; it is intentionally ignored here.


def ce_framewise_loss_ref(output, target, *, reduction='mean', label_smoothing=0.0,
                          class_probs=False, frame_smoothing_kernel=None):
    """Pure-JAX reference mirroring the PyTorch semantics (direct padded conv)."""
    B, T, C = output.shape
    output = output.astype(jnp.float32)
    target = target.astype(jnp.float32)
    if frame_smoothing_kernel is not None:
        w = jnp.asarray(frame_smoothing_kernel, jnp.float32)
        K = w.shape[0]
        P = K // 2
        tpad = jnp.pad(target, ((0, 0), (0, 0), (P, P)))
        target = sum(w[k] * tpad[..., k:k + C] for k in range(K))
    log_p = jax.nn.log_softmax(output, axis=-1)
    if class_probs:
        base = target
    else:
        y = jnp.argmax(target, axis=-1)
        base = jax.nn.one_hot(y, C)
    q = (1.0 - label_smoothing) * base + label_smoothing / C
    per_sample = -jnp.sum(q * log_p, axis=-1)           # (B, T)
    frame_losses = jnp.mean(per_sample, axis=0)         # (T,)  mean over batch per frame
    return jnp.mean(frame_losses) if reduction == 'mean' else jnp.sum(frame_losses)


if __name__ == "__main__":
    key = jax.random.PRNGKey(0)
    k1, k2, k3, k4, k5, k6 = jax.random.split(key, 6)

    def check(name, got, want, atol=1e-4, rtol=1e-3):
        assert jnp.allclose(got, want, atol=atol, rtol=rtol), (name, float(got), float(want))

    # Config A: hard targets + label smoothing + asymmetric 3-tap class smoothing
    # (MXU banded-matmul path); forced small block -> multi-block grid with a
    # partial (masked) last block.
    B1, T1, C1 = 3, 7, 128
    out1 = jax.random.normal(k1, (B1, T1, C1), dtype=jnp.float32)
    tgt1 = jax.nn.softmax(jax.random.normal(k2, (B1, T1, C1), dtype=jnp.float32), axis=-1)
    cfg_a = dict(reduction='mean', label_smoothing=0.1, class_probs=False,
                 frame_smoothing_kernel=(0.2, 0.5, 0.3))
    got = jax.block_until_ready(ce_framewise_loss(out1, tgt1, block_rows=8, **cfg_a))
    check('A', got, ce_framewise_loss_ref(out1, tgt1, **cfg_a))

    # Config B: soft targets, sum reduction, no smoothing, auto block size (single block).
    B2, T2, C2 = 2, 8, 128
    out2 = jax.random.normal(k3, (B2, T2, C2), dtype=jnp.float32)
    tgt2 = jax.nn.softmax(jax.random.normal(k4, (B2, T2, C2), dtype=jnp.float32), axis=-1)
    cfg_b = dict(reduction='sum', label_smoothing=0.0, class_probs=True,
                 frame_smoothing_kernel=None)
    got = jax.block_until_ready(ce_framewise_loss(out2, tgt2, **cfg_b))
    check('B', got, ce_framewise_loss_ref(out2, tgt2, **cfg_b))

    # Config C: soft targets + label smoothing + asymmetric 5-tap smoothing (matmul path).
    cfg_c = dict(reduction='mean', label_smoothing=0.05, class_probs=True,
                 frame_smoothing_kernel=(0.1, 0.15, 0.4, 0.25, 0.1))
    got = jax.block_until_ready(ce_framewise_loss(out2, tgt2, **cfg_c))
    check('C', got, ce_framewise_loss_ref(out2, tgt2, **cfg_c))

    # Config D: large lane-aligned class axis -> pltpu.roll smoothing path, hard targets,
    # forced small block -> partial (masked) last block.
    B3, T3, C3 = 2, 6, 640
    out3 = jax.random.normal(k5, (B3, T3, C3), dtype=jnp.float32)
    tgt3 = jax.nn.softmax(jax.random.normal(k6, (B3, T3, C3), dtype=jnp.float32), axis=-1)
    cfg_d = dict(reduction='mean', label_smoothing=0.0, class_probs=False,
                 frame_smoothing_kernel=(0.25, 0.5, 0.25))
    got = jax.block_until_ready(ce_framewise_loss(out3, tgt3, block_rows=8, **cfg_d))
    check('D', got, ce_framewise_loss_ref(out3, tgt3, **cfg_d))

    print("KERNEL_OK")
</pallas_src>

<mosaic_0001>
module attributes {stable_mosaic.version = 11 : i64} {
  func.func @_ce_framewise_kernel(%arg0: i32, %arg1: memref<8x128xf32, #tpu.memory_space<vmem>>, %arg2: memref<8x128xf32, #tpu.memory_space<vmem>>, %arg3: memref<128x128xf32, #tpu.memory_space<vmem>>, %arg4: memref<8x128xf32, #tpu.memory_space<vmem>>) attributes {dimension_semantics = [#tpu.dimension_semantics<parallel>], iteration_bounds = array<i64: 3>, scalar_prefetch = 0 : i64, scratch_operands = 0 : i64, tpu.core_type = #tpu.core_type<tc>, window_params = [{transform_indices = @transform_0, window_bounds = array<i64: 8, 128>}, {transform_indices = @transform_1, window_bounds = array<i64: 8, 128>}, {pipeline_mode = #tpu.pipeline_mode<synchronous>, transform_indices = @transform_2, window_bounds = array<i64: 128, 128>}, {transform_indices = @transform_3, window_bounds = array<i64: 8, 128>}]} {
    %c0 = arith.constant 0 : index
    %c0_0 = arith.constant 0 : index
    %0 = vector.load %arg1[%c0, %c0_0] : memref<8x128xf32, #tpu.memory_space<vmem>>, vector<8x128xf32>
    %c0_1 = arith.constant 0 : index
    %c0_2 = arith.constant 0 : index
    %1 = vector.load %arg2[%c0_1, %c0_2] : memref<8x128xf32, #tpu.memory_space<vmem>>, vector<8x128xf32>
    %2 = tpu.iota {dimensions = array<i32: 1>} : vector<1x128xi32>
    %c0_3 = arith.constant 0 : index
    %c0_4 = arith.constant 0 : index
    %3 = vector.load %arg3[%c0_3, %c0_4] : memref<128x128xf32, #tpu.memory_space<vmem>>, vector<128x128xf32>
    %cst = arith.constant dense<0.000000e+00> : vector<8x128xf32>
    %4 = tpu.matmul %1, %3, %cst {dimension_numbers = #tpu.dot_dimension_numbers<[1], [0], [0], [1], [0, 0, 1, 1], [], []>, precision = #tpu.contract_precision<fp32>} : vector<8x128xf32>, vector<128x128xf32>, vector<8x128xf32> -> vector<8x128xf32>
    %cst_5 = arith.constant dense<0xFF800000> : vector<8xf32>
    %5 = vector.multi_reduction <maximumf>, %0, %cst_5 [1] : vector<8x128xf32> to vector<8xf32>
    %6 = vector.shape_cast %5 : vector<8xf32> to vector<8x1xf32>
    %7 = vector.broadcast %6 : vector<8x1xf32> to vector<8x128xf32>
    %8 = arith.subf %0, %7 : vector<8x128xf32>
    %9 = math.exp %8 : vector<8x128xf32>
    %cst_6 = arith.constant dense<0.000000e+00> : vector<8xf32>
    %10 = vector.multi_reduction <add>, %9, %cst_6 [1] : vector<8x128xf32> to vector<8xf32>
    %11 = vector.shape_cast %10 : vector<8xf32> to vector<8x1xf32>
    %12 = math.log %11 : vector<8x1xf32>
    %cst_7 = arith.constant dense<0xFF800000> : vector<8xf32>
    %13 = vector.multi_reduction <maximumf>, %4, %cst_7 [1] : vector<8x128xf32> to vector<8xf32>
    %14 = vector.shape_cast %13 : vector<8xf32> to vector<8x1xf32>
    %15 = vector.broadcast %14 : vector<8x1xf32> to vector<8x128xf32>
    %16 = arith.cmpf oeq, %4, %15 : vector<8x128xf32>
    %c128_i32 = arith.constant 128 : i32
    %17 = vector.shape_cast %2 : vector<1x128xi32> to vector<1x128xi32>
    %18 = vector.broadcast %17 : vector<1x128xi32> to vector<8x128xi32>
    %19 = vector.broadcast %c128_i32 : i32 to vector<8x128xi32>
    %20 = arith.select %16, %18, %19 : vector<8x128xi1>, vector<8x128xi32>
    %cst_8 = arith.constant dense<2147483647> : vector<8xi32>
    %21 = vector.multi_reduction <minsi>, %20, %cst_8 [1] : vector<8x128xi32> to vector<8xi32>
    %22 = vector.shape_cast %21 : vector<8xi32> to vector<8x1xi32>
    %23 = vector.broadcast %2 : vector<1x128xi32> to vector<8x128xi32>
    %24 = vector.broadcast %22 : vector<8x1xi32> to vector<8x128xi32>
    %25 = arith.cmpi eq, %23, %24 : vector<8x128xi32>
    %26 = arith.extui %25 : vector<8x128xi1> to vector<8x128xi32>
    %27 = arith.sitofp %26 : vector<8x128xi32> to vector<8x128xf32>
    %cst_9 = arith.constant 0.899999976 : f32
    %28 = vector.broadcast %cst_9 : f32 to vector<8x128xf32>
    %29 = arith.mulf %28, %27 : vector<8x128xf32>
    %cst_10 = arith.constant 7.812500e-04 : f32
    %30 = vector.broadcast %cst_10 : f32 to vector<8x128xf32>
    %31 = arith.addf %29, %30 : vector<8x128xf32>
    %32 = arith.mulf %31, %8 : vector<8x128xf32>
    %cst_11 = arith.constant dense<0.000000e+00> : vector<8xf32>
    %33 = vector.multi_reduction <add>, %32, %cst_11 [1] : vector<8x128xf32> to vector<8xf32>
    %34 = vector.shape_cast %33 : vector<8xf32> to vector<8x1xf32>
    %cst_12 = arith.constant 1.000000e+00 : f32
    %35 = vector.broadcast %cst_12 : f32 to vector<8x1xf32>
    %36 = arith.mulf %35, %12 : vector<8x1xf32>
    %37 = arith.subf %36, %34 : vector<8x1xf32>
    %38 = tpu.iota {dimensions = array<i32: 0>} : vector<8x1xi32>
    %c8_i32 = arith.constant 8 : i32
    %39 = arith.muli %arg0, %c8_i32 : i32
    %40 = vector.broadcast %39 : i32 to vector<8x1xi32>
    %41 = arith.addi %38, %40 : vector<8x1xi32>
    %c21_i32 = arith.constant 21 : i32
    %42 = vector.broadcast %c21_i32 : i32 to vector<8x1xi32>
    %43 = arith.cmpi slt, %41, %42 : vector<8x1xi32>
    %cst_13 = arith.constant 0.000000e+00 : f32
    %44 = vector.broadcast %cst_13 : f32 to vector<8x1xf32>
    %45 = arith.select %43, %37, %44 : vector<8x1xi1>, vector<8x1xf32>
    %cst_14 = arith.constant dense<0.000000e+00> : vector<1xf32>
    %46 = vector.multi_reduction <add>, %45, %cst_14 [0] : vector<8x1xf32> to vector<1xf32>
    %47 = vector.shape_cast %46 : vector<1xf32> to vector<1x1xf32>
    %48 = tpu.iota {dimensions = array<i32: 0>} : vector<8x128xi32>
    %49 = tpu.iota {dimensions = array<i32: 1>} : vector<8x128xi32>
    %50 = vector.shape_cast %47 : vector<1x1xf32> to vector<1x1xf32>
    %51 = vector.broadcast %50 : vector<1x1xf32> to vector<8x128xf32>
    %c0_i32 = arith.constant 0 : i32
    %52 = vector.broadcast %c0_i32 : i32 to vector<8x128xi32>
    %53 = arith.cmpi eq, %48, %52 : vector<8x128xi32>
    %c0_i32_15 = arith.constant 0 : i32
    %54 = vector.broadcast %c0_i32_15 : i32 to vector<8x128xi32>
    %55 = arith.cmpi eq, %49, %54 : vector<8x128xi32>
    %56 = arith.andi %53, %55 : vector<8x128xi1>
    %cst_16 = arith.constant 0.000000e+00 : f32
    %57 = vector.broadcast %cst_16 : f32 to vector<8x128xf32>
    %58 = arith.select %56, %51, %57 : vector<8x128xi1>, vector<8x128xf32>
    %c0_17 = arith.constant 0 : index
    %c0_18 = arith.constant 0 : index
    %59 = vector.load %arg4[%c0_17, %c0_18] : memref<8x128xf32, #tpu.memory_space<vmem>>, vector<8x128xf32>
    tpu.vector_store %arg4[%c0_17, %c0_18], %58 {strides = array<i32>} : memref<8x128xf32, #tpu.memory_space<vmem>>, vector<8x128xf32>,
    return
  }
  func.func @transform_0(%arg0: i32) -> (i32, i32) {
    %c0_i32 = arith.constant 0 : i32
    %c0_i32_0 = arith.constant 0 : i32
    return %arg0, %c0_i32 : i32, i32
  }
  func.func @transform_1(%arg0: i32) -> (i32, i32) {
    %c0_i32 = arith.constant 0 : i32
    %c0_i32_0 = arith.constant 0 : i32
    return %arg0, %c0_i32 : i32, i32
  }
  func.func @transform_2(%arg0: i32) -> (i32, i32) {
    %c0_i32 = arith.constant 0 : i32
    %c0_i32_0 = arith.constant 0 : i32
    %c0_i32_1 = arith.constant 0 : i32
    return %c0_i32, %c0_i32_0 : i32, i32
  }
  func.func @transform_3(%arg0: i32) -> (i32, i32) {
    %c0_i32 = arith.constant 0 : i32
    %c0_i32_0 = arith.constant 0 : i32
    return %arg0, %c0_i32 : i32, i32
  }
}

</mosaic_0001>

<bundles_post_ra>
// kernel: tpu_custom_call.1
= control target key start
LH: loop header
LB: loop body
LE: loop exit
PB: predicated region body
PF: predicated region fallthrough
CT: control target
= control target key end

     0   :  { %8 = vsyncpa [#allocation3], 0  ;;  %s2295_s0 = inlined_call_operand.hbm [shape: f32[21,128], index: 0, kind: input, shape index: {}]   ;;  %s2296_s1 = inlined_call_operand.hbm [shape: f32[21,128], index: 1, kind: input, shape index: {}]   ;;  %s2297_s2 = inlined_call_operand.hbm [shape: f32[128,128], index: 2, kind: input, shape index: {}]   ;;  %s2298_s3 = inlined_call_operand.hbm [shape: f32[24,128], index: 3, kind: output, shape index: {}]  }
   0x1   :  { %10 = vsyncpa [#allocation3 + $0x1], 0 }
   0x2   :  { %11 = vsyncpa [#allocation6], 0 }
   0x3   :  { %13 = vsyncpa [#allocation6 + $0x1], 0 }
   0x4   :  { %14 = vsyncpa [#allocation4], 0 }
   0x5   :  { %16 = vsyncpa [#allocation4 + $0x1], 0  ;;  %s1816_s12 = smov 0   ;;  %s1818_s13 = smov 0  }
   0x6   :  { %s1820_s14 = smov 0   ;;  %s1822_s15 = smov 0  }
   0x7 LB: > { %s1837_s16 = sadd.s32 4294967295, %s1785_s15   ;;  %s1068_s17 = sadd.s32 4294967294, %s1785_s15   ;;  %s1785_s15 = sphi %s1822_s15, %s2319_s15   ;;  %s1781_s14 = sphi %s1820_s14, %s2318_s14   ;;  %s1777_s13 = sphi %s1818_s13, %s2317_s13   ;;  %s1773_s12 = sphi %s1816_s12, %s2316_s12  }
   0x8   : > { %p42_p0 = scmp.ne.s32.totalorder %s1777_s13, %s1773_s12  ;;  %p2299_p1 = scmp.eq.s32.totalorder %s1837_s16, 0 }
   0x9   : > { %p119_p3 = scmp.eq.s32.totalorder %s1068_s17, 2  ;;  %p1069_p5 = scmp.ge.s32.totalorder %s1785_s15, 1 }
   0xa   : > { %p1846_p4 = por %p2299_p1, %p42_p0  ;;  %p126_p7 = scmp.lt.s32.totalorder %s1785_s15, 4 }
   0xb   : > { %p1851_p6 = por %p119_p3, %p42_p0  ;;  %s1787_s21 = smov [#allocation7]  }
   0xc   : > { %s2303_s18 = scalar_select %p1846_p4, 1, 0 }
   0xd   : > { %s2304_s19 = scalar_select %p1851_p6, 1, 0 }
   0xe   : > { %p1856_p8 = pnand %p1069_p5, %p126_p7  ;;  %s138_s22 = sshll.u32 %s1787_s21, 4  ;;  %s139_s22 = int_to_ptr.vmem [resolvable:$true] %s138_s22 }
   0xf   : > { %s1869_s24 = sadd.s32 1, %s1785_s15   ;;  %s29_s25 = sadd.s32 1, %s1781_s14 }
  0x10   : > { %s2305_s20 = scalar_select %p1856_p8, 1, 0 }
  0x11   : > { %p1562_p9 = pneg %p1856_p8  ;;  %s26_s26 = ssub.s32 %s1785_s15, %s1869_s24 }
  0x12   : > { %s1623_s29 = scalar_lea.hbm %s2297_s2, 2048 }
  0x13   : > { %p1864_p10 = pnand %p1562_p9, %p2299_p1  ;;  %p1624_p11 = scmp.ne.s32.totalorder %s2297_s2, %s1623_s29 }
  0x14   : > { %p1630_p3 = scmp.lt.u32.totalorder %s1623_s29, %s2297_s2 }
  0x15   : > { %p1625_p12 = pneg %p1864_p10 }
  0x17   : > { %p1626_p13 = pnand %p1625_p12, %p1624_p11 }
  0x19   : > { %p1627_p0 = pneg %p1626_p13 }
  0x1b   : > { %p1632_p5 = pnand %p1630_p3, %p1627_p0 }
  0x1d   : > { %1635 = shalt.err (!%p1632_p5)
}
  0x1e   : > { %s1636_s7 = scalar_lea.vmem %s139_s22, 2048  ;;  %p1644_p2 = scmp.lt.s32.totalorder %s139_s22, %s139_s22 }
  0x1f   : > { %p1637_p7 = scmp.ne.s32.totalorder %s139_s22, %s1636_s7  ;;  %p1645_p6 = scmp.lt.s32.totalorder %s1636_s7, %s1636_s7 }
  0x21   : > { %p1639_p9 = pnand %p1637_p7, %p1625_p12  ;;  %p1646_p4 = por %p1645_p6, %p1644_p2 }
  0x23   : > { %p1640_p1 = pneg %p1639_p9 }
  0x25   : > { %p1647_p8 = pnand %p1646_p4, %p1640_p1 }
  0x27   : > { %1650 = shalt.err (!%p1647_p8)
}
  0x28   : > { %s1788_s8 = smov 128   ;;  %s1789_s9 = smov 8  }
  0x29   : > { %1565 = dma.hbm_to_vmem [thread:$0]  (!%p1864_p10), %s2297_s2, 2048, %s139_s22, [#allocation6], %s1788_s8, %s1788_s8, %s1789_s9  }
  0x2a   : > { %p27_p11 = scmp.eq.s32.totalorder %s26_s26, 0  ;;  %p36_p2 = scmp.ne.s32.totalorder %s1781_s14, %s1777_s13 }
  0x2b   : > { %p37_p1 = scmp.eq.s32.totalorder %s1785_s15, 0  ;;  %p1578_p4 = scmp.lt.s32.totalorder %s1785_s15, 3 }
  0x2c   : > { %s1895_s17 = scalar_select %p27_p11, %s1781_s14, %s29_s25  }
  0x2d   : > { %p38_p6 = por %p37_p1, %p36_p2  ;;  %p2307_p8 = scmp.eq.s32.totalorder %s1837_s16, 2 }
  0x2e   : > { %s152_s27 = sand.u32 1, %s1781_s14   ;;  %s1073_s28 = sshll.u32 %s1785_s15, 7 }
  0x2f   : > { %p1899_p12 = por %p2307_p8, %p36_p2  ;;  %s1905_s29 = sshll.u32 %s152_s27, 3 }
  0x30   : > { %s1910_s22 = scalar_lea.hbm %s2295_s0, %s1073_s28  ;;  %s156_s25 = scalar_lea.vmem [#allocation2], %s1905_s29 }
  0x31   : > { %s2308_s21 = scalar_select %p1899_p12, 1, 0 }
  0x32   : > { %s163_s26 = sshll.u32 %s156_s25, 4  ;;  %p1913_p10 = pnand %p1578_p4, %p38_p6  ;;  %s1917_s26 = int_to_ptr.vmem [resolvable:$true] %s163_s26 }
  0x33   : > { %s1922_s7 = scalar_lea.hbm %s2296_s1, %s1073_s28  ;;  %s153_s8 = scalar_lea.sflag [#allocation3], %s152_s27 }
  0x34   : > { %s1651_s9 = scalar_lea.hbm %s1910_s22, 128  ;;  %p1653_p0 = pneg %p1913_p10 }
  0x35   : > { %p1652_p13 = scmp.ne.s32.totalorder %s1910_s22, %s1651_s9  ;;  %s1656_s23 = scalar_lea.hbm %s2295_s0, 384 }
  0x36   : > { %p1657_p7 = scmp.lt.u32.totalorder %s1910_s22, %s2295_s0  ;;  %p1658_p9 = scmp.lt.u32.totalorder %s1656_s23, %s1651_s9 }
  0x37   : > { %p1654_p3 = pnand %p1653_p0, %p1652_p13  ;;  %p1660_p2 = scmp.lt.u32.totalorder %s1651_s9, %s1910_s22 }
  0x38   : > { %p1659_p11 = por %p1658_p9, %p1657_p7 }
  0x39   : > { %p1655_p5 = pneg %p1654_p3 }
  0x3a   : > { %p1661_p1 = por %p1660_p2, %p1659_p11 }
  0x3c   : > { %p1662_p4 = pnand %p1661_p1, %p1655_p5 }
  0x3e   : > { %1665 = shalt.err (!%p1662_p4)
}
  0x3f   : > { %s1666_s27 = scalar_lea.vmem %s1917_s26, 128  ;;  %s1790_s28 = smov [#allocation2]  }
  0x40   : > { %p1667_p6 = scmp.ne.s32.totalorder %s1917_s26, %s1666_s27  ;;  %s1671_s5 = sshll.u32 %s1790_s28, 4  ;;  %s1672_s5 = int_to_ptr.vmem [resolvable:$false] %s1671_s5 }
  0x41   : > { %s1673_s6 = scalar_lea.vmem %s1672_s5, 256  ;;  %p1674_p3 = scmp.lt.s32.totalorder %s1917_s26, %s1672_s5 }
  0x42   : > { %p1669_p8 = pnand %p1667_p6, %p1653_p0  ;;  %p1675_p7 = scmp.lt.s32.totalorder %s1673_s6, %s1666_s27 }
  0x44   : > { %p1670_p13 = pneg %p1669_p8  ;;  %p1676_p9 = por %p1675_p7, %p1674_p3 }
  0x46   : > { %p1677_p11 = pnand %p1676_p9, %p1670_p13 }
  0x48   : > { %1680 = shalt.err (!%p1677_p11)
}
  0x49   : > { %1569 = dma.hbm_to_vmem [thread:$0]  (!%p1913_p10), %s1910_s22, 128, %s1917_s26, %s153_s8  }
  0x4a   : > { %s170_s9 = sand.u32 1, %s1785_s15   ;;  %s174_s10 = scalar_lea.vmem [#allocation5], %s1905_s29 }
  0x4b   : > { %s181_s11 = sshll.u32 %s174_s10, 4  ;;  %s171_s23 = scalar_lea.sflag [#allocation6], %s170_s9  ;;  %s182_s11 = int_to_ptr.vmem [resolvable:$true] %s181_s11 }
  0x4c   : > { %s1681_s30 = scalar_lea.hbm %s1922_s7, 128  ;;  %s1686_s28 = scalar_lea.hbm %s2296_s1, 384 }
  0x4d   : > { %p1682_p5 = scmp.ne.s32.totalorder %s1922_s7, %s1681_s30  ;;  %p1687_p4 = scmp.lt.u32.totalorder %s1922_s7, %s2296_s1 }
  0x4e   : > { %p1688_p6 = scmp.lt.u32.totalorder %s1686_s28, %s1681_s30  ;;  %p1690_p13 = scmp.lt.u32.totalorder %s1681_s30, %s1922_s7 }
  0x4f   : > { %p1684_p2 = pnand %p1682_p5, %p1653_p0 }
  0x50   : > { %p1689_p8 = por %p1688_p6, %p1687_p4 }
  0x51   : > { %p1685_p1 = pneg %p1684_p2 }
  0x52   : > { %p1691_p3 = por %p1690_p13, %p1689_p8 }
  0x54   : > { %p1692_p7 = pnand %p1691_p3, %p1685_p1 }
  0x56   : > { %1695 = shalt.err (!%p1692_p7)
}
  0x57   : > { %s1696_s29 = scalar_lea.vmem %s182_s11, 128  ;;  %s1791_s22 = smov [#allocation5]  }
  0x58   : > { %p1697_p9 = scmp.ne.s32.totalorder %s182_s11, %s1696_s29  ;;  %s1701_s26 = sshll.u32 %s1791_s22, 4  ;;  %s1702_s26 = int_to_ptr.vmem [resolvable:$false] %s1701_s26 }
  0x59   : > { %s1703_s8 = scalar_lea.vmem %s1702_s26, 256  ;;  %p1704_p2 = scmp.lt.s32.totalorder %s182_s11, %s1702_s26 }
  0x5a   : > { %p1699_p11 = pnand %p1697_p9, %p1653_p0  ;;  %p1705_p12 = scmp.lt.s32.totalorder %s1703_s8, %s1696_s29 }
  0x5c   : > { %p1700_p5 = pneg %p1699_p11  ;;  %p1706_p4 = por %p1705_p12, %p1704_p2 }
  0x5e   : > { %p1707_p6 = pnand %p1706_p4, %p1700_p5 }
  0x60   : > { %1710 = shalt.err (!%p1707_p6)
}
  0x61   : > { %1572 = dma.hbm_to_vmem [thread:$0]  (!%p1913_p10), %s1922_s7, 128, %s182_s11, %s171_s23  }
  0x62   : > { %p2310_p1 = scmp.ne.s32.totalorder %s2305_s20, 0 }
  0x63   : > { %s1973_s9 = sand.u32 (!%p2310_p1), 1, %s1777_s13   ;;  %p2311_p12 = scmp.ne.s32.totalorder (!%p2310_p1), %s2303_s18, 0 }
  0x64   : > { %190 = sbr.rel (%p2310_p1) target bundleno = 1046 (0x416), region = 32  ;;  %s1976_s10 = sshll.u32 (!%p2310_p1), %s1973_s9, 3 }
  0x65   : > { %s193_s30 = scalar_lea.sflag (!%p2310_p1), [#allocation3], %s1973_s9  ;;  %s196_s25 = scalar_lea.vmem (!%p2310_p1), [#allocation2], %s1976_s10 }
  0x6b   : > { %1756 = dma.done.wait (%p2311_p12), %s193_s30, 128  }
  0x6c   : > { %1758 = vsyncadd (%p2311_p12), %s193_s30, 4294967168  ;;  %s201_s20 = sand.u32 1, %s1837_s16   ;;  %s205_s7 = scalar_lea.vmem [#allocation5], %s1976_s10 }
  0x6d   : > { %s202_s4 = scalar_lea.sflag [#allocation6], %s201_s20 }
  0x6e   : > { %1760 = dma.done.wait (%p2311_p12), %s202_s4, 128  }
  0x6f   : > { %1762 = vsyncadd (%p2311_p12), %s202_s4, 4294967168  ;;  %p2312_p10 = scmp.eq.s32.totalorder %s1837_s16, 0 }
  0x71   : > { %1764 = dma.done.wait (%p2312_p10), [#allocation6], 2048   ;;  %p2313_p0 = pmov %p2312_p10 }
  0x72   : > { %v1792_v0 = vmov 0.0|0.0   ;;  %vm1793_vm0 = vmmov 0   ;;  %v1794_v1 = vmov 0.0   ;;  %v241_v2 = vld [vmem:[#allocation7] sm:$0xff]  ;;  %v242_v3 = vld [vmem:[#allocation7 + $0x8] sm:$0xff]  ;;  %v243_v4 = vld [vmem:[#allocation7 + $0x10] sm:$0xff] }
  0x73   : > { %1766 = vsyncadd (%p2313_p0), [#allocation6], 4294965248  ;;  %1399 = vmatprep.subr.bf16.mxu1 %v1792_v0  ;;  %1471 = vmatprep.subr.bf16.mxu0 %v1792_v0  ;;  %v258_v5 = vand.u32 4294901760, %v241_v2  ;;  %v261_v6 = vand.u32 4294901760, %v242_v3  ;;  %v244_v7 = vld [vmem:[#allocation7 + $0x18] sm:$0xff]  ;;  %v264_v8 = vand.u32 4294901760, %v243_v4 }
  0x74   : > { %1221 = vmatprep.mubr.msk.f32.mxu1 %vm1793_vm0, %v1794_v1  ;;  %1326 = vmatprep.mubr.msk.f32.mxu0 %vm1793_vm0, %v1794_v1  ;;  %v267_v9 = vand.u32 4294901760, %v244_v7  ;;  %v245_v10 = vld [vmem:[#allocation7 + $0x20] sm:$0xff]  ;;  %v246_v11 = vld [vmem:[#allocation7 + $0x28] sm:$0xff]  ;;  %v247_v16 = vld [vmem:[#allocation7 + $0x30] sm:$0xff]  ;;  %s1082_s18 = sshll.u32 %s1837_s16, 3  ;;  %s1084_s11 = sshll.u32 %s1837_s16, 7 }
  0x75   : > { %v2000_v12 = vpack.c.bf16 %v261_v6, %v258_v5  ;;  %v270_v14 = vand.u32 4294901760, %v245_v10  ;;  %v273_v15 = vand.u32 4294901760, %v246_v11  ;;  %v248_v17 = vld [vmem:[#allocation7 + $0x38] sm:$0xff]  ;;  %v276_v19 = vand.u32 4294901760, %v247_v16  ;;  %v2014_v21 = vld [vmem:[#allocation7 + $0x40] sm:$0xff]  ;;  %v2016_v22 = vld [vmem:[#allocation7 + $0x48] sm:$0xff]  ;;  %s2252_s6 = scalar_lea.hbm %s2298_s3, %s1084_s11 }
  0x76   : > { %v2004_v13 = vpack.c.bf16 %v267_v9, %v264_v8  ;;  %v279_v20 = vand.u32 4294901760, %v248_v17  ;;  %v282_v24 = vand.u32 4294901760, %v2014_v21  ;;  %v285_v25 = vand.u32 4294901760, %v2016_v22  ;;  %v238_v26 = vld [vmem:[%s205_s7] sm:$0xff]  ;;  %v2044_v35 = vld [vmem:[#allocation7 + $0x60] sm:$0xff]  ;;  %v2048_v36 = vld [vmem:[#allocation7 + $0x68] sm:$0xff] }
  0x77   : > { %1401 = vmatpush3.bf16.msra.mxu1 %v2000_v12  ;;  %1473 = vmatpush3.bf16.msra.mxu0 %v2000_v12  ;;  %v2010_v18 = vpack.c.bf16 %v273_v15, %v270_v14  ;;  %v2028_v27 = vld [vmem:[#allocation7 + $0x50] sm:$0xff]  ;;  %v2030_v28 = vld [vmem:[#allocation7 + $0x58] sm:$0xff]  ;;  %v2032_v29 = vsub.f32 %v241_v2, %v258_v5  ;;  %v2034_v30 = vand.u32 4294901760, %v238_v26  ;;  %v2036_v31 = vsub.f32 %v242_v3, %v261_v6  ;;  %s236_s23 = scalar_lea.vmem [#allocation8], %s1976_s10  ;;  %s953_s29 = scalar_lea.sflag [#allocation4], %s1973_s9 }
  0x78   : > { %1402 = vmatprep.subr.bf16.mxu1 %v1792_v0  ;;  %1474 = vmatprep.subr.bf16.mxu0 %v1792_v0  ;;  %v2020_v23 = vpack.c.bf16 %v279_v20, %v276_v19  ;;  %v2040_v32 = vpack.c.bf16 %v285_v25, %v282_v24  ;;  %v288_v33 = vand.u32 4294901760, %v2028_v27  ;;  %v291_v34 = vand.u32 4294901760, %v2030_v28  ;;  %v2067_v43 = vld [vmem:[#allocation7 + $0x70] sm:$0xff]  ;;  %v2069_v44 = vld [vmem:[#allocation7 + $0x78] sm:$0xff]  ;;  %s966_s27 = sshll.u32 %s236_s23, 4  ;;  %p2314_p13 = scmp.ne.s32.totalorder %s2308_s21, 0  ;;  %s2254_s27 = int_to_ptr.vmem [resolvable:$true] %s966_s27 }
  0x79   : > { %v2050_v37 = vsub.f32 %v243_v4, %v264_v8  ;;  %v2052_v38 = vsub.f32 %v244_v7, %v267_v9  ;;  %v294_v39 = vand.u32 4294901760, %v2044_v35  ;;  %v2056_v40 = vsub.f32 %v238_v26, %v2034_v30  ;;  %s1711_s22 = scalar_lea.vmem %s2254_s27, 128  ;;  %s1795_s16 = smov [#allocation8]  }
  0x7a   : > { %v2064_v41 = vpack.c.bf16 %v291_v34, %v288_v33  ;;  %v297_v42 = vand.u32 4294901760, %v2048_v36  ;;  %v351_v45 = vand.u32 4294901760, %v2032_v29  ;;  %v358_v46 = vand.u32 4294901760, %v2036_v31  ;;  %p1712_p8 = scmp.ne.s32.totalorder %s2254_s27, %s1711_s22  ;;  %s1715_s26 = sshll.u32 %s1795_s16, 4  ;;  %s1716_s26 = int_to_ptr.vmem [resolvable:$false] %s1715_s26 }
  0x7b   : > { %1404 = vmatpush3.bf16.msra.mxu1 %v2004_v13  ;;  %1476 = vmatpush3.bf16.msra.mxu0 %v2004_v13  ;;  %v2075_v47 = vsub.f32 %v245_v10, %v270_v14  ;;  %v2077_v48 = vsub.f32 %v246_v11, %v273_v15  ;;  %v300_v49 = vand.u32 4294901760, %v2067_v43  ;;  %v303_v50 = vand.u32 4294901760, %v2069_v44  ;;  %s1717_s8 = scalar_lea.vmem %s1716_s26, 256  ;;  %p1718_p9 = scmp.lt.s32.totalorder %s2254_s27, %s1716_s26 }
  0x7c   : > { %1405 = vmatprep.subr.bf16.mxu1 %v1792_v0  ;;  %1477 = vmatprep.subr.bf16.mxu0 %v1792_v0  ;;  %v340_v51 = vand.u32 4294901760, %v2056_v40  ;;  %v365_v52 = vand.u32 4294901760, %v2050_v37  ;;  %v2089_v53 = vpack.c.bf16 %v297_v42, %v294_v39  ;;  %v352_v54 = vsub.f32 %v2032_v29, %v351_v45  ;;  %p1713_p3 = pnand %p1712_p8, %p2314_p13  ;;  %p1719_p11 = scmp.lt.s32.totalorder %s1717_s8, %s1711_s22 }
  0x7d   : > { %v359_v55 = vsub.f32 %v2036_v31, %v358_v46  ;;  %v372_v56 = vand.u32 4294901760, %v2052_v38  ;;  %v2096_v57 = vsub.f32 %v247_v16, %v276_v19  ;;  %v2098_v58 = vsub.f32 %v248_v17, %v279_v20 }
  0x7e   : > { %v341_v59 = vsub.f32 %v2056_v40, %v340_v51  ;;  %v366_v60 = vsub.f32 %v2050_v37, %v365_v52  ;;  %v379_v61 = vand.u32 4294901760, %v2075_v47  ;;  %v386_v62 = vand.u32 4294901760, %v2077_v48  ;;  %p1714_p7 = pneg %p1713_p3  ;;  %p1720_p5 = por %p1719_p11, %p1718_p9 }
  0x7f   : > { %1407 = vmatpush3.bf16.msra.mxu1 %v2010_v18  ;;  %1479 = vmatpush3.bf16.msra.mxu0 %v2010_v18  ;;  %v2110_v63 = vpack.c.bf16 %v303_v50, %v300_v49  ;;  %v353_v2 = vand.u32 4294901760, %v352_v54  ;;  %v360_v3 = vand.u32 4294901760, %v359_v55  ;;  %v373_v4 = vsub.f32 %v2052_v38, %v372_v56 }
  0x80   : > { %1408 = vmatprep.subr.bf16.mxu1 %v1792_v0  ;;  %1480 = vmatprep.subr.bf16.mxu0 %v1792_v0  ;;  %v2116_v5 = vsub.f32 %v2014_v21, %v282_v24  ;;  %v2119_v6 = vsub.f32 %v2016_v22, %v285_v25  ;;  %v1496_v7 = vpack.c.bf16 %v358_v46, %v351_v45  ;;  %v342_v8 = vand.u32 4294901760, %v341_v59  ;;  %p1721_p2 = pnand %p1720_p5, %p1714_p7 }
  0x81   : > { %v367_v9 = vand.u32 4294901760, %v366_v60  ;;  %v380_v10 = vsub.f32 %v2075_v47, %v379_v61  ;;  %v387_v11 = vsub.f32 %v2077_v48, %v386_v62  ;;  %v1424_v14 = vpack.c.bf16 %v360_v3, %v353_v2 }
  0x82   : > { %v374_v15 = vand.u32 4294901760, %v373_v4  ;;  %v393_v16 = vand.u32 4294901760, %v2096_v57  ;;  %v400_v17 = vand.u32 4294901760, %v2098_v58  ;;  %v2132_v19 = vsub.f32 %v2028_v27, %v288_v33 }
  0x83   : > { %1410 = vmatpush3.bf16.msra.mxu1 %v2020_v23  ;;  %1482 = vmatpush3.bf16.msra.mxu0 %v2020_v23  ;;  %v2137_v20 = vsub.f32 %v2030_v28, %v291_v34  ;;  %v1499_v21 = vpack.c.bf16 %v372_v56, %v365_v52  ;;  %v381_v22 = vand.u32 4294901760, %v380_v10  ;;  %v388_v24 = vand.u32 4294901760, %v387_v11 }
  0x84   : > { %1411 = vmatprep.subr.bf16.mxu1 %v1792_v0  ;;  %1483 = vmatprep.subr.bf16.mxu0 %v1792_v0  ;;  %v407_v25 = vand.u32 4294901760, %v2116_v5  ;;  %v1427_v26 = vpack.c.bf16 %v374_v15, %v367_v9  ;;  %v394_v45 = vsub.f32 %v2096_v57, %v393_v16  ;;  %v401_v27 = vsub.f32 %v2098_v58, %v400_v17 }
  0x85   : > { %v414_v33 = vand.u32 4294901760, %v2119_v6  ;;  %v2148_v28 = vsub.f32 %v2044_v35, %v294_v39  ;;  %v2153_v34 = vsub.f32 %v2048_v36, %v297_v42  ;;  %v1430_v46 = vpack.c.bf16 %v388_v24, %v381_v22 }
  0x86   : > { %v408_v52 = vsub.f32 %v2116_v5, %v407_v25  ;;  %v421_v54 = vand.u32 4294901760, %v2132_v19  ;;  %v395_v35 = vand.u32 4294901760, %v394_v45  ;;  %v402_v39 = vand.u32 4294901760, %v401_v27 }
  0x87   : > { %1413 = vmatpush3.bf16.msra.mxu1 %v2040_v32  ;;  %1485 = vmatpush3.bf16.msra.mxu0 %v2040_v32  ;;  %v415_v55 = vsub.f32 %v2119_v6, %v414_v33  ;;  %v428_v36 = vand.u32 4294901760, %v2137_v20  ;;  %v2168_v42 = vsub.f32 %v2067_v43, %v300_v49  ;;  %v2173_v56 = vsub.f32 %v2069_v44, %v303_v50 }
  0x88   : > { %1414 = vmatprep.subr.bf16.mxu1 %v1792_v0  ;;  %1486 = vmatprep.subr.bf16.mxu0 %v1792_v0  ;;  %v1505_v59 = vpack.c.bf16 %v400_v17, %v393_v16  ;;  %v409_v60 = vand.u32 4294901760, %v408_v52  ;;  %v1433_v2 = vpack.c.bf16 %v402_v39, %v395_v35  ;;  %v442_v43 = vand.u32 4294901760, %v2153_v34 }
  0x89   : > { %v416_v3 = vand.u32 4294901760, %v415_v55  ;;  %v429_v4 = vsub.f32 %v2137_v20, %v428_v36  ;;  %v1508_v44 = vpack.c.bf16 %v414_v33, %v407_v25  ;;  %v456_v11 = vand.u32 4294901760, %v2173_v56 }
  0x8a   : > { %v443_v10 = vsub.f32 %v2153_v34, %v442_v43 }
  0x8b   : > { %1416 = vmatpush3.bf16.msra.mxu1 %v2064_v41  ;;  %1488 = vmatpush3.bf16.msra.mxu0 %v2064_v41  ;;  %v430_v9 = vand.u32 4294901760, %v429_v4  ;;  %v457_v22 = vsub.f32 %v2173_v56, %v456_v11 }
  0x8c   : > { %1417 = vmatprep.subr.bf16.mxu1 %v1792_v0  ;;  %1489 = vmatprep.subr.bf16.mxu0 %v1792_v0  ;;  %v444_v17 = vand.u32 4294901760, %v443_v10 }
  0x8d   : > { %v458_v45 = vand.u32 4294901760, %v457_v22 }
  0x8f   : > { %1419 = vmatpush3.bf16.msra.mxu1 %v2089_v53  ;;  %1491 = vmatpush3.bf16.msra.mxu0 %v2089_v53 }
  0x90   : > { %1420 = vmatprep.subr.bf16.mxu1 %v1792_v0  ;;  %1492 = vmatprep.subr.bf16.mxu0 %v1792_v0 }
  0x93   : > { %1422 = vmatpush3.bf16.msra.mxu1 %v2110_v63  ;;  %1494 = vmatpush3.bf16.msra.mxu0 %v2110_v63 }
  0x94   : > { %1423 = vmatprep.subr.bf16.mxu1 %v1792_v0  ;;  %1495 = vmatprep.subr.bf16.mxu0 %v1792_v0 }
  0x96   : > { %1222 = vmatmul.mubr.f32.vlgmr.msra.gmra.mrb[0].mxu1 %v342_v8  ;;  %1327 = vmatmul.mubr.f32.vlgmr.msra.gmra.mrb[0].mxu0 %v340_v51  ;;  %v1502_v51 = vpack.c.bf16 %v386_v62, %v379_v61  ;;  %v422_v61 = vsub.f32 %v2132_v19, %v421_v54  ;;  %v435_v62 = vand.u32 4294901760, %v2148_v28  ;;  %v1436_v8 = vpack.c.bf16 %v416_v3, %v409_v60 }
  0x97   : > { %1425 = vmatpush3.bf16.msra.mxu1 %v1424_v14  ;;  %1497 = vmatpush3.bf16.msra.mxu0 %v1496_v7  ;;  %v449_v7 = vand.u32 4294901760, %v2168_v42  ;;  %v1511_v14 = vpack.c.bf16 %v428_v36, %v421_v54 }
  0x98   : > { %1426 = vmatprep.subr.bf16.mxu1 %v1792_v0  ;;  %1498 = vmatprep.subr.bf16.mxu0 %v1792_v0  ;;  %v423_v49 = vand.u32 4294901760, %v422_v61  ;;  %v436_v50 = vsub.f32 %v2148_v28, %v435_v62  ;;  %v1514_v25 = vpack.c.bf16 %v442_v43, %v435_v62 }
  0x99   : > { %1256 = vmatprep.mubr.msk.f32.mxu1 %vm1793_vm0, %v1794_v1  ;;  %1361 = vmatprep.mubr.msk.f32.mxu0 %vm1793_vm0, %v1794_v1  ;;  %v1517_v33 = vpack.c.bf16 %v456_v11, %v449_v7 }
  0x9a   : > { %v437_v15 = vand.u32 4294901760, %v436_v50  ;;  %v1439_v16 = vpack.c.bf16 %v430_v9, %v423_v49 }
  0x9b   : > { %1428 = vmatpush3.bf16.msra.mxu1 %v1427_v26  ;;  %1500 = vmatpush3.bf16.msra.mxu0 %v1499_v21  ;;  %v450_v21 = vsub.f32 %v2168_v42, %v449_v7 }
  0x9c   : > { %1429 = vmatprep.subr.bf16.mxu1 %v1792_v0  ;;  %1501 = vmatprep.subr.bf16.mxu0 %v1792_v0  ;;  %v1442_v24 = vpack.c.bf16 %v444_v17, %v437_v15 }
  0x9d   : > { %v451_v26 = vand.u32 4294901760, %v450_v21 }
  0x9f   : > { %1431 = vmatpush3.bf16.msra.mxu1 %v1430_v46  ;;  %1503 = vmatpush3.bf16.msra.mxu0 %v1502_v51  ;;  %v1445_v27 = vpack.c.bf16 %v458_v45, %v451_v26  ;;  %v1448_v46 = vpack.c.bf16 %v2036_v31, %v2032_v29  ;;  %v1451_v51 = vpack.c.bf16 %v2052_v38, %v2050_v37 }
  0xa0   : > { %1432 = vmatprep.subr.bf16.mxu1 %v1792_v0  ;;  %1504 = vmatprep.subr.bf16.mxu0 %v1792_v0  ;;  %v1454_v29 = vpack.c.bf16 %v2077_v48, %v2075_v47  ;;  %v1469_v31 = vpack.c.bf16 %v2173_v56, %v2168_v42  ;;  %v237_v48 = vld [vmem:[%s196_s25] sm:$0xff] }
  0xa1   : > { %898 = vmax.xlane.f32.xlu1 %v237_v48 }
  0xa3   : > { %1434 = vmatpush3.bf16.msra.mxu1 %v1433_v2  ;;  %1506 = vmatpush3.bf16.msra.mxu0 %v1505_v59  ;;  %v937_v2 = vstv %s1082_s18 }
  0xa4   : > { %1435 = vmatprep.subr.bf16.mxu1 %v1792_v0  ;;  %1507 = vmatprep.subr.bf16.mxu0 %v1792_v0 }
  0xa7   : > { %1437 = vmatpush3.bf16.msra.mxu1 %v1436_v8  ;;  %1509 = vmatpush3.bf16.msra.mxu0 %v1508_v44 }
  0xa8   : > { %1438 = vmatprep.subr.bf16.mxu1 %v1792_v0  ;;  %1510 = vmatprep.subr.bf16.mxu0 %v1792_v0 }
  0xab   : > { %1440 = vmatpush3.bf16.msra.mxu1 %v1439_v16  ;;  %1512 = vmatpush3.bf16.msra.mxu0 %v1511_v14 }
  0xac   : > { %1441 = vmatprep.subr.bf16.mxu1 %v1792_v0  ;;  %1513 = vmatprep.subr.bf16.mxu0 %v1792_v0 }
  0xaf   : > { %1443 = vmatpush3.bf16.msra.mxu1 %v1442_v24  ;;  %1515 = vmatpush3.bf16.msra.mxu0 %v1514_v25 }
  0xb0   : > { %1444 = vmatprep.subr.bf16.mxu1 %v1792_v0  ;;  %1516 = vmatprep.subr.bf16.mxu0 %v1792_v0 }
  0xb3   : > { %1446 = vmatpush3.bf16.msra.mxu1 %v1445_v27  ;;  %1518 = vmatpush3.bf16.msra.mxu0 %v1517_v33 }
  0xb4   : > { %1447 = vmatprep.subr.bf16.mxu1 %v1792_v0  ;;  %1519 = vmatprep.subr.bf16.mxu0 %v1792_v0 }
  0xb6   : > { %1257 = vmatmul.mubr.f32.vlgmr.msra.gmra.mrb[0].mxu1 %v2034_v30  ;;  %1362 = vmatmul.mubr.f32.vlgmr.msra.gmra.mrb[0].mxu0 %v2034_v30 }
  0xb7   : > { %1449 = vmatpush3.bf16.msra.mxu1 %v1448_v46  ;;  %1521 = vmatpush3.bf16.msra.mxu0 %v2000_v12  ;;  %v1457_v12 = vpack.c.bf16 %v2098_v58, %v2096_v57 }
  0xb8   : > { %1450 = vmatprep.subr.bf16.mxu1 %v1792_v0  ;;  %1522 = vmatprep.subr.bf16.mxu0 %v1792_v0 }
  0xb9   : > { %1291 = vmatprep.mubr.msk.f32.mxu1 %vm1793_vm0, %v1794_v1  ;;  %1396 = vmatprep.mubr.msk.f32.mxu0 %vm1793_vm0, %v1794_v1 }
  0xbb   : > { %1452 = vmatpush3.bf16.msra.mxu1 %v1451_v51  ;;  %1524 = vmatpush3.bf16.msra.mxu0 %v2004_v13  ;;  %v1460_v13 = vpack.c.bf16 %v2119_v6, %v2116_v5 }
  0xbc   : > { %1453 = vmatprep.subr.bf16.mxu1 %v1792_v0  ;;  %1525 = vmatprep.subr.bf16.mxu0 %v1792_v0 }
  0xbf   : > { %1455 = vmatpush3.bf16.msra.mxu1 %v1454_v29  ;;  %1527 = vmatpush3.bf16.msra.mxu0 %v2010_v18  ;;  %v1463_v18 = vpack.c.bf16 %v2137_v20, %v2132_v19 }
  0xc0   : > { %1456 = vmatprep.subr.bf16.mxu1 %v1792_v0  ;;  %1528 = vmatprep.subr.bf16.mxu0 %v1792_v0 }
  0xc3   : > { %1458 = vmatpush3.bf16.msra.mxu1 %v1457_v12  ;;  %1530 = vmatpush3.bf16.msra.mxu0 %v2020_v23  ;;  %v1466_v23 = vpack.c.bf16 %v2153_v34, %v2148_v28 }
  0xc4   : > { %1459 = vmatprep.subr.bf16.mxu1 %v1792_v0  ;;  %1531 = vmatprep.subr.bf16.mxu0 %v1792_v0 }
  0xc7   : > { %1461 = vmatpush3.bf16.msra.mxu1 %v1460_v13  ;;  %1533 = vmatpush3.bf16.msra.mxu0 %v2040_v32 }
  0xc8   : > { %1462 = vmatprep.subr.bf16.mxu1 %v1792_v0  ;;  %1534 = vmatprep.subr.bf16.mxu0 %v1792_v0 }
  0xcb   : > { %1464 = vmatpush3.bf16.msra.mxu1 %v1463_v18  ;;  %1536 = vmatpush3.bf16.msra.mxu0 %v2064_v41 }
  0xcc   : > { %1465 = vmatprep.subr.bf16.mxu1 %v1792_v0  ;;  %1537 = vmatprep.subr.bf16.mxu0 %v1792_v0 }
  0xcf   : > { %1467 = vmatpush3.bf16.msra.mxu1 %v1466_v23  ;;  %1539 = vmatpush3.bf16.msra.mxu0 %v2089_v53  ;;  %v239_v53 = vlaneseq }
  0xd0   : > { %1468 = vmatprep.subr.bf16.mxu1 %v1792_v0  ;;  %1540 = vmatprep.subr.bf16.mxu0 %v1792_v0 }
  0xd1   : > { %v240_v57 = vand.u32 127, %v239_v53  ;;  %v935_v62 = vshrl.u32 %v239_v53, 7 }
  0xd3   : > { %1470 = vmatpush3.bf16.msra.mxu1 %v1469_v31  ;;  %1542 = vmatpush3.bf16.msra.mxu0 %v2110_v63  ;;  %v938_v4 = vadd.s32 %v937_v2, %v935_v62  ;;  %vm947_vm5 = vcmp.eq.s32.totalorder %v935_v62, 0  ;;  %vm948_vm6 = vcmp.eq.s32.totalorder %v240_v57, 0 }
  0xd4   : > { %vm949_vm7 = vmand %vm947_vm5, %vm948_vm6 }
  0xd5   : > { %vm939_vm4 = vcmp.lt.s32.totalorder %v938_v4, 21 }
  0xd6   : > { %1292 = vmatmul.mubr.f32.vlgmr.msra.gmra.mrb[0].mxu1 %v2056_v40  ;;  %1397 = vmatmul.mubr.f32.vlgmr.msra.gmra.mrb[0].mxu0 %v2034_v30 }
 0x12e   : > { %v899_v40 = vpop.xlane.xlu1 %898 }
 0x12f   : > { %v900_v6 = vsub.f32 %v237_v48, %v899_v40 }
 0x131   : > { %v901_v30 = vmul.f32 1.442695, %v900_v6 }
 0x133   : > { %1619 = vpow2.f32 %v901_v30 }
 0x13d   : > { %v1620_v19 = vpop.eup %1619 }
 0x1a9   : > { %v599_v32 = vpop.f32.mrb[0].mxu1  ;;  %v894_v37 = vpop.f32.mrb[0].mxu0 }
 0x1aa   : > { %v1543_v38 = vadd.f32 %v894_v37, %v599_v32  ;;  %v1293_v41 = vpop.f32.mrb[1].mxu1  ;;  %v1398_v47 = vpop.f32.mrb[1].mxu0 }
 0x1ac   : > { %907 = vmax.xlane.f32.xlu0 %v1543_v38 }
 0x239   : > { %v908_v58 = vpop.xlane.xlu0 %907 }
 0x23a   : > { %vm909_vm1 = vcmp.eq.f32.partialorder %v1543_v38, %v908_v58 }
 0x23b   : > { %v910_v0 = vsel %vm909_vm1, %v240_v57, 128 }
 0x23c   : > { %v912_v5 = vshra.s32 %v910_v0, 16  ;;  %v911_v20 = vand.u32 65535, %v910_v0 }
 0x23e   : > { %v914_v63 = vcvt.s32.f32 %v912_v5  ;;  %v913_v34 = vcvt.s32.f32 %v911_v20 }
 0x240   : > { %915 = vmin.xlane.f32.xlu0 %v914_v63 }
 0x244   : > { %903 = vadd.xlane.f32.xlu0 %v1620_v19 }
 0x2cd   : > { %v916_v28 = vpop.xlane.xlu0 %915 }
 0x2ce   : > { %vm917_vm2 = vcmp.eq.f32.partialorder %v914_v63, %v916_v28  ;;  %v922_v54 = vcvt.f32.s32 %v916_v28 }
 0x2cf   : > { %v918_v52 = vsel %vm917_vm2, %v913_v34, inf }
 0x2d0   : > { %919 = vmin.xlane.f32.xlu1 %v918_v52  ;;  %v923_v39 = vshll.u32 %v922_v54, 16 }
 0x2d1   : > { %v904_v61 = vpop.xlane.xlu0 %903 }
 0x2d2   : > { %1621 = vlog2.f32 %v904_v61 }
 0x2dc   : > { %v1622_v3 = vpop.eup %1621 }
 0x2dd   : > { %v906_v43 = vmul.f32 0.6931472, %v1622_v3 }
 0x35d   : > { %v920_v35 = vpop.xlane.xlu1 %919 }
 0x35e   : > { %v921_v55 = vcvt.f32.s32 %v920_v35 }
 0x360   : > { %v924_v36 = vadd.s32 %v923_v39, %v921_v55 }
 0x362   : > { %vm925_vm3 = vcmp.eq.s32.totalorder %v240_v57, %v924_v36 }
 0x363   : > { %v1081_v42 = vsel %vm925_vm3, 1.0, %v1794_v1 }
 0x364   : > { %v928_v56 = vmul.f32 0.9, %v1081_v42 }
 0x366   : > { %v929_v59 = vadd.f32 0.00078125, %v928_v56 }
 0x368   : > { %v930_v60 = vmul.f32 %v929_v59, %v900_v6 }
 0x36a   : > { %931 = vadd.xlane.f32.xlu1 %v930_v60 }
 0x3f7   : > { %v932_v44 = vpop.xlane.xlu1 %931 }
 0x3f8   : > { %v933_v49 = vsub.f32 %v906_v43, %v932_v44 }
 0x3fa   : > { %v940_v50 = vsel %vm939_vm4, %v933_v49, 0.0 }
 0x3fb   : > { %v941_v7 = vrot.slane %v940_v50, 4 }
 0x3fd   : > { %v942_v1 = vadd.f32 %v941_v7, %v940_v50 }
 0x3ff   : > { %v943_v8 = vrot.slane %v942_v1, 2 }
 0x401   : > { %v944_v9 = vadd.f32 %v943_v8, %v942_v1 }
 0x403   : > { %v945_v10 = vrot.slane %v944_v9, 1 }
 0x405   : > { %v946_v11 = vadd.f32 %v945_v10, %v944_v9 }
 0x407   : > { %v950_v14 = vsel %vm949_vm7, %v946_v11, 0.0 }
 0x408   : > { %951 = vst [vmem:[%s236_s23] sm:$0xff] %v950_v14 }
 0x409   : > { %1724 = shalt.err (!%p1721_p2)
}
 0x40a   : > { %s1725_s9 = scalar_lea.hbm %s2252_s6, 128  ;;  %s1729_s25 = scalar_lea.hbm %s2298_s3, 384 }
 0x40b   : > { %p1726_p4 = scmp.ne.s32.totalorder %s2252_s6, %s1725_s9  ;;  %p1730_p12 = scmp.lt.u32.totalorder %s2252_s6, %s2298_s3 }
 0x40c   : > { %p1731_p10 = scmp.lt.u32.totalorder %s1729_s25, %s1725_s9  ;;  %p1733_p8 = scmp.lt.u32.totalorder %s1725_s9, %s2252_s6 }
 0x40d   : > { %p1727_p6 = pnand %p1726_p4, %p2314_p13 }
 0x40e   : > { %p1732_p0 = por %p1731_p10, %p1730_p12 }
 0x40f   : > { %p1728_p1 = pneg %p1727_p6 }
 0x410   : > { %p1734_p3 = por %p1733_p8, %p1732_p0 }
 0x412   : > { %p1735_p7 = pnand %p1734_p3, %p1728_p1 }
 0x414   : > { %1738 = shalt.err (!%p1735_p7)
}
 0x415   : > { %1560 = dma.vmem_to_hbm [thread:$0]  (%p2314_p13), %s2254_s27, 128, %s2252_s6, %s953_s29  }
 0x416 PF: > { %p1580_p9 = scmp.ge.s32.totalorder %s1785_s15, 2  ;;  %s978_s7 = sand.u32 1, %s1773_s12  }
 0x417   : > { %p2315_p11 = scmp.ne.s32.totalorder %s2304_s19, 0  ;;  %s979_s18 = scalar_lea.sflag [#allocation4], %s978_s7 }
 0x419   : > { %p1574_p5 = pnand %p1580_p9, %p2315_p11 }
 0x41b   : > { %1768 = dma.done.wait (!%p1574_p5), %s979_s18, 128  }
 0x41c   : > { %1770 = vsyncadd (!%p1574_p5), %s979_s18, 4294967168  ;;  %p19_p2 = scmp.ge.s32.totalorder %s1869_s24, 5   ;;  %s2316_s12 = smov %s1777_s13 }
 0x41d   : > { %s2317_s13 = smov %s1781_s14  ;;  %s2318_s14 = smov %s1895_s17 }
 0x41e   : > { %s2319_s15 = smov %s1869_s24  ;;  %21 = sbr.rel (!%p19_p2) target bundleno = 7 (0x7), region = 94 }
 0x425   :  { %984 = vsyncpa [#allocation3], 1 }
 0x426   :  { %986 = vsyncpa [#allocation3 + $0x1], 1 }
 0x427   :  { %987 = vsyncpa [#allocation6], 1 }
 0x428   :  { %989 = vsyncpa [#allocation6 + $0x1], 1 }
 0x429   :  { %990 = vsyncpa [#allocation4], 1 }
 0x42a   :  { %992 = vsyncpa [#allocation4 + $0x1], 1 }

</bundles_post_ra>
